<compile_context>
chip_gen: v5e
topology: v5e:2x2
jax: 0.10.0
libtpu: 0.0.40
codegen_flags: <defaults>
</compile_context>

<pallas_src>
import functools

import jax
import jax.numpy as jnp
from jax.experimental import pallas as pl
from jax.experimental.pallas import tpu as pltpu


# ---------------------------------------------------------------------------
# Kernel
# ---------------------------------------------------------------------------
def _vae_loss_kernel(tgt_ref, logits_ref, mu_ref, lv_ref, out_ref,
                     *, inv_tokens, inv_batch):
    i = pl.program_id(0)

    # Per-tile cast from native dtype (bf16/f32) to f32 for the reduction math.
    logits = logits_ref[...].astype(jnp.float32)           # (TILE_N, V)
    tgt = tgt_ref[...]                                      # (TILE_N, 1) int32

    # log-softmax NLL with the target "gather" fused into the exp pass:
    # z = logits - rowmax is computed once and reused for exp() and the pick.
    m = jnp.max(logits, axis=-1, keepdims=True)             # (TILE_N, 1)   XLU
    z = logits - m                                          # (TILE_N, V)   VPU
    sum_e = jnp.sum(jnp.exp(z), axis=-1, keepdims=True)     # (TILE_N, 1)   EUP-bound
    col = jax.lax.broadcasted_iota(jnp.int32, z.shape, 1)   # per-tile constant
    picked_z = jnp.sum(jnp.where(col == tgt, z, 0.0),
                       axis=-1, keepdims=True)              # = picked_logit - m
    ce = jnp.log(sum_e) - picked_z                          # = logsumexp - picked
    ce = jnp.where(tgt == 0, 0.0, ce)                       # ignore_index=0 -> 0 loss
    # (padded rows also carry target 0, so they contribute nothing)

    # This tile's share of mean_b(mean_s(CE)) == sum(CE) / (B*S).
    partial_sum = jnp.sum(ce) * inv_tokens                  # scalar f32
    out_ref[...] = jnp.full(out_ref.shape, partial_sum, dtype=out_ref.dtype)

    # KL term added once (tile 0).  mu/log_var blocks are grid-invariant
    # (index_map returns the same block), so they stay resident in VMEM.
    @pl.when(i == 0)
    def _():
        mu = mu_ref[...].astype(jnp.float32)                # (B, Z)
        lv = lv_ref[...].astype(jnp.float32)                # (B, Z)
        kl_mean = jnp.sum(-0.5 * (1.0 + lv - mu * mu - jnp.exp(lv))) * inv_batch
        out_ref[...] = out_ref[...] + kl_mean


# ---------------------------------------------------------------------------
# Wrapper
# ---------------------------------------------------------------------------
def _vmem_capacity_bytes():
    """Chip VMEM capacity (conservative v7x fallback if the query is unavailable)."""
    try:
        return int(pltpu.get_tpu_info().vmem_capacity_bytes)
    except Exception:
        return 64 * 1024 * 1024


def _pick_tile_n(n_tokens, vocab, itemsize, vmem_cap):
    """Largest token tile that fits VMEM and (preferably) divides the token count.

    VMEM budget per row: double-buffered native-dtype input (2*itemsize) plus
    ~3 tile-sized f32 intermediates (cast / z / exp) inside the kernel.
    """
    bytes_per_row = max(vocab * (2 * itemsize + 3 * 4), 1)
    budget = max(vmem_cap // 2, 4 << 20)
    max_tile = budget // bytes_per_row
    max_tile = max(8, min(1024, (max_tile // 8) * 8))
    n_pad8 = ((n_tokens + 7) // 8) * 8
    max_tile = min(max_tile, n_pad8)
    # Prefer the largest sublane-aligned tile dividing the 8-aligned token count
    # so no padded copy of the logits array is ever needed (when n_tokens % 8 == 0).
    for t in range(max_tile, 7, -8):
        if n_pad8 % t == 0:
            return t
    return 8


def vae_loss_pallas(x, reconstruction, mu, log_var):
    """x: (B, S) int tokens; reconstruction: (B, S, V) logits (any float dtype);
    mu, log_var: (B, Z). Returns scalar f32 loss."""
    B, S, V = reconstruction.shape
    Z = mu.shape[1]
    N = B * S

    logits = reconstruction.reshape(N, V)                   # native dtype, no upcast
    tgt = x.reshape(N, 1).astype(jnp.int32)

    itemsize = jnp.dtype(logits.dtype).itemsize
    vmem_cap = _vmem_capacity_bytes()
    tile_n = _pick_tile_n(N, V, itemsize, vmem_cap)
    num_tiles = -(-N // tile_n)
    n_pad = num_tiles * tile_n
    if n_pad != N:
        # Only reachable when N % 8 != 0 (pads < 8 rows); padded targets are 0
        # (ignore_index), so padded rows contribute nothing.
        logits = jnp.pad(logits, ((0, n_pad - N), (0, 0)))
        tgt = jnp.pad(tgt, ((0, n_pad - N), (0, 0)))

    tile_native = tile_n * V * itemsize
    tile_f32 = tile_n * V * 4
    vmem_limit = int(min(vmem_cap * 3 // 4,
                         max(16 * 1024 * 1024,
                             2 * tile_native + 4 * tile_f32 + (4 << 20))))

    kernel = functools.partial(
        _vae_loss_kernel,
        inv_tokens=1.0 / float(N),
        inv_batch=1.0 / float(B),
    )

    cost = pl.CostEstimate(
        flops=int(6 * N * V + 4 * B * Z),
        transcendentals=int(N * V + N + B * Z),             # exp/log dominated (EUP)
        bytes_accessed=int(n_pad * V * itemsize + n_pad * 4
                           + 2 * B * Z * 4 + num_tiles * 8 * 128 * 4),
    )

    partials = pl.pallas_call(
        kernel,
        out_shape=jax.ShapeDtypeStruct((num_tiles, 8, 128), jnp.float32),
        grid_spec=pltpu.PrefetchScalarGridSpec(
            num_scalar_prefetch=0,
            grid=(num_tiles,),
            in_specs=[
                pl.BlockSpec((tile_n, 1), lambda i: (i, 0)),   # targets (sublane)
                pl.BlockSpec((tile_n, V), lambda i: (i, 0)),   # streamed logits tile
                pl.BlockSpec((B, Z), lambda i: (0, 0)),        # mu   (VMEM-resident)
                pl.BlockSpec((B, Z), lambda i: (0, 0)),        # lvar (VMEM-resident)
            ],
            out_specs=pl.BlockSpec((1, 8, 128), lambda i: (i, 0, 0)),
        ),
        compiler_params=pltpu.CompilerParams(
            dimension_semantics=("parallel",),                 # shards across TCs on v7x
            vmem_limit_bytes=vmem_limit,
        ),
        cost_estimate=cost,
    )(tgt, logits, mu, log_var)

    # Tiny final reduction over per-tile partials (num_tiles scalars).
    return jnp.sum(partials[:, 0, 0])


# ---------------------------------------------------------------------------
# Pure-JAX reference mirroring the PyTorch module.
# ---------------------------------------------------------------------------
def vae_loss_ref(x, reconstruction, mu, log_var):
    B, S, V = reconstruction.shape
    logits = reconstruction.reshape(B * S, V).astype(jnp.float32)
    tgt = x.reshape(B * S).astype(jnp.int32)
    logp = jax.nn.log_softmax(logits, axis=-1)
    nll = -jnp.take_along_axis(logp, tgt[:, None], axis=-1)[:, 0]
    nll = jnp.where(tgt == 0, 0.0, nll)
    rec_term = jnp.mean(nll.reshape(B, S), axis=-1)
    kl_term = jnp.sum(-0.5 * (1.0 + log_var - mu * mu - jnp.exp(log_var)), axis=1)
    return jnp.mean(rec_term + kl_term)


if __name__ == "__main__":
    key = jax.random.PRNGKey(0)
    k1, k2, k3, k4 = jax.random.split(key, 4)

    B, S, V, Z = 2, 8, 32, 16  # batch, seq, vocab, latent
    # Tokens in [0, V); force a few zeros so ignore_index=0 is exercised.
    x = jax.random.randint(k1, (B, S), 0, V, dtype=jnp.int32)
    x = x.at[0, 0].set(0).at[1, 3].set(0)
    reconstruction = jax.random.normal(k2, (B, S, V), dtype=jnp.float32)
    mu = 0.5 * jax.random.normal(k3, (B, Z), dtype=jnp.float32)
    log_var = 0.1 * jax.random.normal(k4, (B, Z), dtype=jnp.float32)

    loss = jax.block_until_ready(vae_loss_pallas(x, reconstruction, mu, log_var))
    ref = jax.block_until_ready(vae_loss_ref(x, reconstruction, mu, log_var))

    assert jnp.allclose(loss, ref, rtol=1e-5, atol=1e-5), (loss, ref)
    print("KERNEL_OK")
</pallas_src>

<mosaic_0001>
module attributes {stable_mosaic.version = 11 : i64} {
  func.func @_vae_loss_kernel(%arg0: i32, %arg1: memref<16x1xi32, #tpu.memory_space<vmem>>, %arg2: memref<16x32xf32, #tpu.memory_space<vmem>>, %arg3: memref<2x16xf32, #tpu.memory_space<vmem>>, %arg4: memref<2x16xf32, #tpu.memory_space<vmem>>, %arg5: memref<1x8x128xf32, #tpu.memory_space<vmem>>) attributes {dimension_semantics = [#tpu.dimension_semantics<parallel>], iteration_bounds = array<i64: 1>, scalar_prefetch = 0 : i64, scratch_operands = 0 : i64, tpu.core_type = #tpu.core_type<tc>, window_params = [{transform_indices = @transform_0, window_bounds = array<i64: 16, 1>}, {transform_indices = @transform_1, window_bounds = array<i64: 16, 32>}, {pipeline_mode = #tpu.pipeline_mode<synchronous>, transform_indices = @transform_2, window_bounds = array<i64: 2, 16>}, {pipeline_mode = #tpu.pipeline_mode<synchronous>, transform_indices = @transform_3, window_bounds = array<i64: 2, 16>}, {transform_indices = @transform_4, window_bounds = array<i64: 1, 8, 128>}]} {
    %c0 = arith.constant 0 : index
    %c0_0 = arith.constant 0 : index
    %0 = vector.load %arg2[%c0, %c0_0] : memref<16x32xf32, #tpu.memory_space<vmem>>, vector<16x32xf32>
    %c0_1 = arith.constant 0 : index
    %c0_2 = arith.constant 0 : index
    %1 = vector.load %arg1[%c0_1, %c0_2] : memref<16x1xi32, #tpu.memory_space<vmem>>, vector<16x1xi32>
    %cst = arith.constant dense<0xFF800000> : vector<16xf32>
    %2 = vector.multi_reduction <maximumf>, %0, %cst [1] : vector<16x32xf32> to vector<16xf32>
    %3 = vector.shape_cast %2 : vector<16xf32> to vector<16x1xf32>
    %4 = vector.broadcast %3 : vector<16x1xf32> to vector<16x32xf32>
    %5 = arith.subf %0, %4 : vector<16x32xf32>
    %6 = math.exp %5 : vector<16x32xf32>
    %cst_3 = arith.constant dense<0.000000e+00> : vector<16xf32>
    %7 = vector.multi_reduction <add>, %6, %cst_3 [1] : vector<16x32xf32> to vector<16xf32>
    %8 = vector.shape_cast %7 : vector<16xf32> to vector<16x1xf32>
    %9 = tpu.iota {dimensions = array<i32: 1>} : vector<16x32xi32>
    %10 = vector.broadcast %1 : vector<16x1xi32> to vector<16x32xi32>
    %11 = arith.cmpi eq, %9, %10 : vector<16x32xi32>
    %cst_4 = arith.constant 0.000000e+00 : f32
    %12 = vector.broadcast %cst_4 : f32 to vector<16x32xf32>
    %13 = arith.select %11, %5, %12 : vector<16x32xi1>, vector<16x32xf32>
    %cst_5 = arith.constant dense<0.000000e+00> : vector<16xf32>
    %14 = vector.multi_reduction <add>, %13, %cst_5 [1] : vector<16x32xf32> to vector<16xf32>
    %15 = vector.shape_cast %14 : vector<16xf32> to vector<16x1xf32>
    %16 = math.log %8 : vector<16x1xf32>
    %17 = arith.subf %16, %15 : vector<16x1xf32>
    %c0_i32 = arith.constant 0 : i32
    %18 = vector.broadcast %c0_i32 : i32 to vector<16x1xi32>
    %19 = arith.cmpi eq, %1, %18 : vector<16x1xi32>
    %cst_6 = arith.constant 0.000000e+00 : f32
    %20 = vector.broadcast %cst_6 : f32 to vector<16x1xf32>
    %21 = arith.select %19, %20, %17 : vector<16x1xi1>, vector<16x1xf32>
    %22 = vector.shape_cast %21 : vector<16x1xf32> to vector<1x16x1xf32>
    %cst_7 = arith.constant dense<0.000000e+00> : vector<1xf32>
    %23 = vector.multi_reduction <add>, %22, %cst_7 [1, 2] : vector<1x16x1xf32> to vector<1xf32>
    %24 = vector.shape_cast %23 : vector<1xf32> to vector<1x1x1xf32>
    %25 = vector.extract %24[0, 0, 0] : f32 from vector<1x1x1xf32>
    %cst_8 = arith.constant 6.250000e-02 : f32
    %26 = arith.mulf %25, %cst_8 : f32
    %27 = vector.broadcast %26 : f32 to vector<1x8x128xf32>
    %c0_9 = arith.constant 0 : index
    %c0_10 = arith.constant 0 : index
    %c0_11 = arith.constant 0 : index
    %28 = vector.load %arg5[%c0_9, %c0_10, %c0_11] : memref<1x8x128xf32, #tpu.memory_space<vmem>>, vector<1x8x128xf32>
    tpu.vector_store %arg5[%c0_9, %c0_10, %c0_11], %27 {strides = array<i32>} : memref<1x8x128xf32, #tpu.memory_space<vmem>>, vector<1x8x128xf32>,
    %c0_i32_12 = arith.constant 0 : i32
    %29 = arith.cmpi eq, %arg0, %c0_i32_12 : i32
    %30 = arith.extui %29 : i1 to i32
    %c0_i32_13 = arith.constant 0 : i32
    %31 = arith.cmpi ne, %30, %c0_i32_13 : i32
    scf.if %31 {
      %c0_14 = arith.constant 0 : index
      %c0_15 = arith.constant 0 : index
      %32 = vector.load %arg3[%c0_14, %c0_15] : memref<2x16xf32, #tpu.memory_space<vmem>>, vector<2x16xf32>
      %c0_16 = arith.constant 0 : index
      %c0_17 = arith.constant 0 : index
      %33 = vector.load %arg4[%c0_16, %c0_17] : memref<2x16xf32, #tpu.memory_space<vmem>>, vector<2x16xf32>
      %cst_18 = arith.constant 1.000000e+00 : f32
      %34 = vector.broadcast %cst_18 : f32 to vector<2x16xf32>
      %35 = arith.addf %34, %33 : vector<2x16xf32>
      %36 = arith.mulf %32, %32 : vector<2x16xf32>
      %37 = arith.subf %35, %36 : vector<2x16xf32>
      %38 = math.exp %33 : vector<2x16xf32>
      %39 = arith.subf %37, %38 : vector<2x16xf32>
      %cst_19 = arith.constant -5.000000e-01 : f32
      %40 = vector.broadcast %cst_19 : f32 to vector<2x16xf32>
      %41 = arith.mulf %40, %39 : vector<2x16xf32>
      %42 = vector.shape_cast %41 : vector<2x16xf32> to vector<1x2x16xf32>
      %cst_20 = arith.constant dense<0.000000e+00> : vector<1xf32>
      %43 = vector.multi_reduction <add>, %42, %cst_20 [1, 2] : vector<1x2x16xf32> to vector<1xf32>
      %44 = vector.shape_cast %43 : vector<1xf32> to vector<1x1x1xf32>
      %45 = vector.extract %44[0, 0, 0] : f32 from vector<1x1x1xf32>
      %cst_21 = arith.constant 5.000000e-01 : f32
      %46 = arith.mulf %45, %cst_21 : f32
      %c0_22 = arith.constant 0 : index
      %c0_23 = arith.constant 0 : index
      %c0_24 = arith.constant 0 : index
      %47 = vector.load %arg5[%c0_22, %c0_23, %c0_24] : memref<1x8x128xf32, #tpu.memory_space<vmem>>, vector<1x8x128xf32>
      %48 = vector.broadcast %46 : f32 to vector<1x8x128xf32>
      %49 = arith.addf %47, %48 : vector<1x8x128xf32>
      %c0_25 = arith.constant 0 : index
      %c0_26 = arith.constant 0 : index
      %c0_27 = arith.constant 0 : index
      %50 = vector.load %arg5[%c0_25, %c0_26, %c0_27] : memref<1x8x128xf32, #tpu.memory_space<vmem>>, vector<1x8x128xf32>
      tpu.vector_store %arg5[%c0_25, %c0_26, %c0_27], %49 {strides = array<i32>} : memref<1x8x128xf32, #tpu.memory_space<vmem>>, vector<1x8x128xf32>,
    } else {
    }
    return
  }
  func.func @transform_0(%arg0: i32) -> (i32, i32) {
    %c0_i32 = arith.constant 0 : i32
    %c0_i32_0 = arith.constant 0 : i32
    return %arg0, %c0_i32 : i32, i32
  }
  func.func @transform_1(%arg0: i32) -> (i32, i32) {
    %c0_i32 = arith.constant 0 : i32
    %c0_i32_0 = arith.constant 0 : i32
    return %arg0, %c0_i32 : i32, i32
  }
  func.func @transform_2(%arg0: i32) -> (i32, i32) {
    %c0_i32 = arith.constant 0 : i32
    %c0_i32_0 = arith.constant 0 : i32
    %c0_i32_1 = arith.constant 0 : i32
    return %c0_i32, %c0_i32_0 : i32, i32
  }
  func.func @transform_3(%arg0: i32) -> (i32, i32) {
    %c0_i32 = arith.constant 0 : i32
    %c0_i32_0 = arith.constant 0 : i32
    %c0_i32_1 = arith.constant 0 : i32
    return %c0_i32, %c0_i32_0 : i32, i32
  }
  func.func @transform_4(%arg0: i32) -> (i32, i32, i32) {
    %c0_i32 = arith.constant 0 : i32
    %c0_i32_0 = arith.constant 0 : i32
    %c0_i32_1 = arith.constant 0 : i32
    return %arg0, %c0_i32, %c0_i32_0 : i32, i32, i32
  }
}

</mosaic_0001>

<bundles_post_ra>
// kernel: tpu_custom_call.1
= control target key start
LH: loop header
LB: loop body
LE: loop exit
PB: predicated region body
PF: predicated region fallthrough
CT: control target
= control target key end

     0   :  { %9 = vsyncpa [#allocation3], 0  ;;  %s275_s0 = inlined_call_operand.vmem [shape: s32[16,1], index: 0, kind: input, shape index: {}]   ;;  %s276_s1 = inlined_call_operand.vmem [shape: f32[16,32], index: 1, kind: input, shape index: {}]   ;;  %s277_s2 = inlined_call_operand.vmem [shape: f32[2,16], index: 2, kind: input, shape index: {}]   ;;  %s278_s3 = inlined_call_operand.hbm [shape: f32[2,16], index: 3, kind: input, shape index: {}]   ;;  %s279_s4 = inlined_call_operand.hbm [shape: f32[1,8,128], index: 4, kind: output, shape index: {}]  }
   0x1   :  { %10 = vsyncpa [#allocation4], 0  ;;  %s22_s17 = sshll.u32 %s278_s3, 4  ;;  %s216_s18 = smov [#allocation2]   ;;  %s23_s17 = int_to_ptr.hbm [resolvable:$true] %s22_s17 }
   0x2   :  { %s24_s19 = sshll.u32 %s216_s18, 4  ;;  %s25_s19 = int_to_ptr.vmem [resolvable:$true] %s24_s19 }
   0x3   :  { %27 = dma.hbm_to_vmem [thread:$0]  %s23_s17, 32, %s25_s19, [#allocation3]  }
   0x4   :  { %212 = dma.done.wait [#allocation3], 32  }
   0x5   :  { %213 = vsyncadd [#allocation3], 4294967264  ;;  %v217_v0 = vmov 0   ;;  %vm36_vm0 = vcmask 261120   ;;  %v32_v1 = vld [vmem:[%s276_s1] sm:$0xff]  ;;  %v33_v4 = vld [vmem:[%s276_s1 + $0x8] sm:$0xff]  ;;  %v55_v7 = vlaneseq }
   0x6   :  { %152 = vset.pattern.permute.xlu1 %v217_v0  ;;  %153 = vset.pattern.permute.xlu0 %v217_v0  ;;  %v253_v2 = vld [vmem:[%s275_s0] sm:$0xff]  ;;  %v37_v3 = vsel %vm36_vm0, %v32_v1, -inf  ;;  %v35_v5 = vld [vmem:[%s275_s0 + $0x8] sm:$0xff]  ;;  %v40_v6 = vsel %vm36_vm0, %v33_v4, -inf  ;;  %vm112_vm3 = vcmask 123904   ;;  %vm83_vm6 = vcmask 7168  }
   0x7   :  { %58 = vperm.xlu1 %152, %v253_v2   ;;  %38 = vmax.xlane.f32.xlu0 %v37_v3  ;;  %v56_v8 = vand.u32 127, %v55_v7  ;;  %v104_v25 = vld [vmem:[#allocation2] sm:$0x3]  ;;  %v103_v27 = vld [vmem:[%s277_s2] sm:$0x3]  ;;  %vm79_vm4 = vcmp.eq.s32.totalorder %v253_v2, 0 }
   0x8   :  { %v108_v26 = vmul.f32 1.442695, %v104_v25  ;;  %v105_v28 = vadd.f32 1.0, %v104_v25  ;;  %v106_v29 = vmul.f32 %v103_v27, %v103_v27  ;;  %vm80_vm5 = vcmp.eq.s32.totalorder %v35_v5, 0  ;;  %s218_s27 = smov [#allocation5]   ;;  %s135_s8 = sshll.u32 %s279_s4, 4  ;;  %s136_s8 = int_to_ptr.hbm [resolvable:$true] %s135_s8 }
   0x9   :  { %s133_s28 = sshll.u32 %s218_s27, 4  ;;  %s134_s28 = int_to_ptr.vmem [resolvable:$true] %s133_s28 }
   0xa   :  { %v107_v30 = vsub.f32 %v105_v28, %v106_v29 }
   0xf   :  { %61 = vperm.xlu1 %152, %v35_v5   ;;  %41 = vmax.xlane.f32.xlu0 %v40_v6 }
  0x79   :  { %v59_v9 = vpop.permute.xlu1 %58 }
  0x7a   :  { %v39_v10 = vpop.xlane.xlu0 %38  ;;  %vm63_vm1 = vcmp.eq.s32.totalorder %v56_v8, %v59_v9 }
  0x7b   :  { %v43_v11 = vsub.f32 %v32_v1, %v39_v10 }
  0x7d   :  { %v45_v12 = vmul.f32 1.442695, %v43_v11  ;;  %v65_v13 = vsel %vm63_vm1, %v43_v11, 0.0 }
  0x7e   :  { %v67_v14 = vsel %vm36_vm0, %v65_v13, 0.0 }
  0x7f   :  { %154 = vpow2.f32 %v45_v12  ;;  %68 = vadd.xlane.f32.xlu0 %v67_v14 }
  0x81   :  { %v62_v15 = vpop.permute.xlu1 %61 }
  0x82   :  { %v42_v16 = vpop.xlane.xlu0 %41  ;;  %vm64_vm2 = vcmp.eq.s32.totalorder %v56_v8, %v62_v15 }
  0x83   :  { %v44_v17 = vsub.f32 %v33_v4, %v42_v16 }
  0x85   :  { %v155_v18 = vpop.eup %154  ;;  %v47_v19 = vmul.f32 1.442695, %v44_v17  ;;  %v66_v20 = vsel %vm64_vm2, %v44_v17, 0.0 }
  0x86   :  { %v49_v21 = vsel %vm36_vm0, %v155_v18, 0.0  ;;  %v70_v22 = vsel %vm36_vm0, %v66_v20, 0.0 }
  0x87   :  { %156 = vpow2.f32 %v47_v19  ;;  %50 = vadd.xlane.f32.xlu2 %v49_v21  ;;  %71 = vadd.xlane.f32.xlu1 %v70_v22 }
  0x88   :  { %158 = vpow2.f32 %v108_v26 }
  0x8d   :  { %v157_v23 = vpop.eup %156 }
  0x8e   :  { %v52_v24 = vsel %vm36_vm0, %v157_v23, 0.0  ;;  %v159_v31 = vpop.eup %158 }
  0x8f   :  { %53 = vadd.xlane.f32.xlu2 %v52_v24  ;;  %v110_v32 = vsub.f32 %v107_v30, %v159_v31 }
  0x91   :  { %v111_v33 = vmul.f32 -0.5, %v110_v32 }
  0x93   :  { %v113_v34 = vsel %vm112_vm3, %v111_v33, 0.0 }
  0x94   :  { %114 = vadd.xlane.f32.xlu0 %v113_v34 }
  0xf2   :  { %v69_v39 = vpop.xlane.xlu0 %68 }
  0xfa   :  { %v51_v35 = vpop.xlane.xlu2 %50  ;;  %v72_v43 = vpop.xlane.xlu1 %71 }
  0xfb   :  { %160 = vlog2.f32 %v51_v35 }
 0x101   :  { %v161_v36 = vpop.eup %160 }
 0x102   :  { %v54_v37 = vpop.xlane.xlu2 %53  ;;  %v74_v38 = vmul.f32 0.6931472, %v161_v36 }
 0x103   :  { %162 = vlog2.f32 %v54_v37 }
 0x104   :  { %v77_v40 = vsub.f32 %v74_v38, %v69_v39 }
 0x106   :  { %v81_v45 = vsel %vm79_vm4, 0.0, %v77_v40 }
 0x107   :  { %v84_v47 = vsel %vm83_vm6, %v81_v45, 0.0  ;;  %v115_v50 = vpop.xlane.xlu0 %114 }
 0x108   :  { %v116_v51 = vrot.slane %v115_v50, 4 }
 0x109   :  { %v163_v41 = vpop.eup %162 }
 0x10a   :  { %v76_v42 = vmul.f32 0.6931472, %v163_v41  ;;  %v117_v52 = vadd.f32 %v116_v51, %v115_v50 }
 0x10c   :  { %v78_v44 = vsub.f32 %v76_v42, %v72_v43  ;;  %v118_v54 = vrot.slane %v117_v52, 2 }
 0x10e   :  { %v82_v46 = vsel %vm80_vm5, 0.0, %v78_v44  ;;  %v119_v57 = vadd.f32 %v118_v54, %v117_v52 }
 0x10f   :  { %v85_v48 = vsel %vm83_vm6, %v82_v46, 0.0 }
 0x110   :  { %v86_v49 = vadd.f32 %v85_v48, %v84_v47  ;;  %v120_v60 = vrot.slane %v119_v57, 1 }
 0x112   :  { %87 = vadd.xlane.f32.xlu2 %v86_v49  ;;  %v121_v63 = vadd.f32 %v120_v60, %v119_v57 }
 0x185   :  { %v88_v53 = vpop.xlane.xlu2 %87 }
 0x186   :  { %v89_v55 = vrot.slane %v88_v53, 4 }
 0x188   :  { %v90_v56 = vadd.f32 %v89_v55, %v88_v53 }
 0x18a   :  { %v91_v58 = vrot.slane %v90_v56, 2 }
 0x18c   :  { %v92_v59 = vadd.f32 %v91_v58, %v90_v56 }
 0x18e   :  { %v93_v61 = vrot.slane %v92_v59, 1 }
 0x190   :  { %v94_v62 = vadd.f32 %v93_v61, %v92_v59 }
 0x192   :  { %145 = vpush %v94_v62 }
 0x193   :  { %147 = vpush %v121_v63 }
 0x1c3   :  { %s146_s2 = spop %145 }
 0x1c4   :  { %s96_s29 = smul.f32 0.0625, %s146_s2  ;;  %s148_s30 = spop %147 }
 0x1c5   :  { %s123_s5 = smul.f32 0.5, %s148_s30 }
 0x1c6   :  { %v97_v0 = vstv %s96_s29 }
 0x1c7   :  { %v125_v1 = vstv %s123_s5 }
 0x1c8   :  { %v126_v2 = vadd.f32 %v125_v1, %v97_v0 }
 0x1ca   :  { %127 = vst [vmem:[#allocation5] sm:$0xff] %v126_v2 }
 0x1cb   :  { %138 = dma.vmem_to_hbm [thread:$0]  %s134_s28, 128, %s136_s8, [#allocation4]  }
 0x1cc   :  { %214 = dma.done.wait [#allocation4], 128  }
 0x1cd   :  { %215 = vsyncadd [#allocation4], 4294967168 }
 0x1ce   :  { %143 = vsyncpa [#allocation3], 1 }
 0x1cf   :  { %144 = vsyncpa [#allocation4], 1 }

</bundles_post_ra>
